<compile_context>
chip_gen: v6e
topology: v6e:2x2x1
jax: 0.10.0
libtpu: 0.0.40
codegen_flags: <defaults>
</compile_context>

<pallas_src>
import jax
import jax.numpy as jnp
from jax.experimental import pallas as pl
from jax.experimental.pallas import tpu as pltpu


def _mean_act_kernel(x_ref, o_ref):
    x = x_ref[...]
    # exp -> EUP, clamp -> two VPU ops. For sub-f32 inputs compute in f32
    # (required on v5e, which has no bf16 VPU/EUP; harmless elsewhere since the
    # kernel is memory-bound and tiles are budgeted on the storage dtype).
    if x.dtype != jnp.float32:
        x = x.astype(jnp.float32)
    y = jnp.clip(jnp.exp(x), 1e-05, 1e6)
    o_ref[...] = y.astype(o_ref.dtype)


_LANE_CHOICES = (4096, 2048, 1024, 512, 256, 128)
_TILE_BYTES = 2 * 1024 * 1024  # per-buffer tile budget (x4 total: double-buffered in + out)


def _as_lane_dense_2d(x):
    """Free (row-major) reshape of x to a 2-D slab with a lane-dense last dim."""
    n = x.size
    divisors = [c for c in _LANE_CHOICES if n % c == 0]
    if divisors:
        # Largest lane width that still yields >= 8 sublane rows, else most rows.
        c = next((c for c in divisors if n // c >= 8), divisors[-1])
        return x.reshape(n // c, c)
    # Ragged element count (not a multiple of 128): keep the original trailing
    # dim as lanes. Partial-lane stores are masked, but there is no HBM copy.
    if x.ndim >= 2:
        return x.reshape(-1, x.shape[-1])
    return x.reshape(1, n)


def mean_act(x, *, tile_bytes=_TILE_BYTES):
    """MeanAct forward: clamp(exp(x), 1e-5, 1e6). Accepts any shape, preserves dtype."""
    orig_shape = x.shape
    if x.size == 0:
        return x

    x2 = _as_lane_dense_2d(x)
    M, N = x2.shape
    itemsize = jnp.dtype(x2.dtype).itemsize

    # Rows per tile from the VMEM byte budget.
    if M <= 8:
        tm = M  # block == full row extent is always a legal tiling
    else:
        tm = tile_bytes // (N * itemsize)
        tm = max(8, min(tm, M))
        tm = (tm // 8) * 8  # sublane dim must be a multiple of 8
        # Keep at least 2 grid steps when possible (v7x megacore + pipelining).
        if M >= 16 and pl.cdiv(M, tm) < 2:
            half = (M + 1) // 2
            tm = max(8, ((half + 7) // 8) * 8)

    grid = (pl.cdiv(M, tm),)

    out = pl.pallas_call(
        _mean_act_kernel,
        out_shape=jax.ShapeDtypeStruct((M, N), x2.dtype),
        grid_spec=pltpu.PrefetchScalarGridSpec(
            num_scalar_prefetch=0,
            grid=grid,
            in_specs=[pl.BlockSpec((tm, N), lambda i: (i, 0))],
            out_specs=pl.BlockSpec((tm, N), lambda i: (i, 0)),
        ),
        compiler_params=pltpu.CompilerParams(
            dimension_semantics=("parallel",)),
    )(x2)

    return out.reshape(orig_shape)


if __name__ == "__main__":
    key = jax.random.PRNGKey(0)

    # scHSC feeds (batch, genes)-shaped decoder outputs into MeanAct.
    # Small deterministic example: batch=8, hidden=32 (lane-dense reshape path).
    x = jax.random.normal(key, (8, 32), dtype=jnp.float32) * 3.0
    y = jax.block_until_ready(mean_act(x))
    y_ref = jnp.clip(jnp.exp(x), 1e-05, 1e6)
    assert y.shape == x.shape and y.dtype == x.dtype
    assert jnp.allclose(y, y_ref, rtol=1e-6, atol=1e-6)

    # Second small case exercising the ragged (non-multiple-of-128) fallback
    # path and a masked last row-block (M=37 not divisible by the row tile).
    x2 = jax.random.normal(jax.random.PRNGKey(1), (37, 200), dtype=jnp.float32) * 3.0
    y2 = jax.block_until_ready(mean_act(x2))
    y2_ref = jnp.clip(jnp.exp(x2), 1e-05, 1e6)
    assert y2.shape == x2.shape and y2.dtype == x2.dtype
    assert jnp.allclose(y2, y2_ref, rtol=1e-6, atol=1e-6)

    print("KERNEL_OK")
</pallas_src>

<mosaic_0001>
module attributes {stable_mosaic.version = 11 : i64} {
  func.func @_mean_act_kernel(%arg0: i32, %arg1: memref<2x128xf32, #tpu.memory_space<vmem>>, %arg2: memref<2x128xf32, #tpu.memory_space<vmem>>) attributes {dimension_semantics = [#tpu.dimension_semantics<parallel>], iteration_bounds = array<i64: 1>, scalar_prefetch = 0 : i64, scratch_operands = 0 : i64, tpu.core_type = #tpu.core_type<tc>, window_params = [{transform_indices = @transform_0, window_bounds = array<i64: 2, 128>}, {transform_indices = @transform_1, window_bounds = array<i64: 2, 128>}]} {
    %c0 = arith.constant 0 : index
    %c0_0 = arith.constant 0 : index
    %0 = vector.load %arg1[%c0, %c0_0] : memref<2x128xf32, #tpu.memory_space<vmem>>, vector<2x128xf32>
    %1 = math.exp %0 : vector<2x128xf32>
    %cst = arith.constant 9.99999974E-6 : f32
    %cst_1 = arith.constant 1.000000e+06 : f32
    %2 = vector.broadcast %cst : f32 to vector<2x128xf32>
    %3 = arith.maximumf %2, %1 : vector<2x128xf32>
    %4 = vector.broadcast %cst_1 : f32 to vector<2x128xf32>
    %5 = arith.minimumf %4, %3 : vector<2x128xf32>
    %c0_2 = arith.constant 0 : index
    %c0_3 = arith.constant 0 : index
    %6 = vector.load %arg2[%c0_2, %c0_3] : memref<2x128xf32, #tpu.memory_space<vmem>>, vector<2x128xf32>
    tpu.vector_store %arg2[%c0_2, %c0_3], %5 {strides = array<i32>} : memref<2x128xf32, #tpu.memory_space<vmem>>, vector<2x128xf32>,
    return
  }
  func.func @transform_0(%arg0: i32) -> (i32, i32) {
    %c0_i32 = arith.constant 0 : i32
    %c0_i32_0 = arith.constant 0 : i32
    return %arg0, %c0_i32 : i32, i32
  }
  func.func @transform_1(%arg0: i32) -> (i32, i32) {
    %c0_i32 = arith.constant 0 : i32
    %c0_i32_0 = arith.constant 0 : i32
    return %arg0, %c0_i32 : i32, i32
  }
}

</mosaic_0001>

<bundles_post_ra>
// kernel: tpu_custom_call.1
= control target key start
LH: loop header
LB: loop body
LE: loop exit
PB: predicated region body
PF: predicated region fallthrough
CT: control target
= control target key end

     0   :  { %6 = vsyncpa [#allocation3], 0  ;;  %s108_s0 = inlined_call_operand.hbm [shape: f32[2,128], index: 0, kind: input, shape index: {}]   ;;  %s109_s1 = inlined_call_operand.hbm [shape: f32[2,128], index: 1, kind: output, shape index: {}]  }
   0x1   :  { %7 = vsyncpa [#allocation4], 0  ;;  %s90_s6 = smov [#allocation2]  }
   0x2   :  { %s14_s7 = sshll.u32 %s90_s6, 4  ;;  %s15_s7 = int_to_ptr.vmem [resolvable:$true] %s14_s7 }
   0x3   :  { %s54_s8 = scalar_lea.vmem %s15_s7, 32  ;;  %p59_p1 = scmp.lt.s32.totalorder %s15_s7, %s15_s7 }
   0x4   :  { %p55_p0 = scmp.ne.s32.totalorder %s15_s7, %s54_s8  ;;  %p60_p2 = scmp.lt.s32.totalorder %s54_s8, %s54_s8 }
   0x6   :  { %p61_p3 = por %p60_p2, %p59_p1 }
   0x8   :  { %p62_p4 = pnand %p61_p3, %p55_p0 }
   0xa   :  { %65 = shalt.err (!%p62_p4)
}
   0xb   :  { %17 = dma.hbm_to_vmem [thread:$0]  %s108_s0, 32, %s15_s7, [#allocation3]  }
   0xc   :  { %86 = dma.done.wait [#allocation3], 32  }
   0xd   :  { %87 = vsyncadd [#allocation3], 4294967264  ;;  %v21_v0 = vld [vmem:[#allocation2] sm:$0x3]  ;;  %s91_s11 = smov [#allocation5]  }
   0xe   :  { %v22_v1 = vmul.f32 1.442695, %v21_v0  ;;  %s33_s12 = sshll.u32 %s91_s11, 4  ;;  %s34_s12 = int_to_ptr.vmem [resolvable:$true] %s33_s12 }
   0xf   :  { %s66_s13 = scalar_lea.vmem %s34_s12, 32  ;;  %p71_p6 = scmp.lt.s32.totalorder %s34_s12, %s34_s12 }
  0x10   :  { %44 = vpow2.f32 %v22_v1  ;;  %p67_p5 = scmp.ne.s32.totalorder %s34_s12, %s66_s13  ;;  %p72_p7 = scmp.lt.s32.totalorder %s66_s13, %s66_s13 }
  0x12   :  { %p73_p8 = por %p72_p7, %p71_p6 }
  0x14   :  { %p74_p9 = pnand %p73_p8, %p67_p5 }
  0x1d   :  { %v45_v2 = vpop.eup %44 }
  0x1e   :  { %v24_v3 = vmax.f32 %v45_v2, 1e-05 }
  0x20   :  { %v25_v4 = vmin.f32 %v24_v3, 1000000.0 }
  0x22   :  { %26 = vst [vmem:[#allocation5] sm:$0x3] %v25_v4 }
  0x23   :  { %77 = shalt.err (!%p74_p9)
}
  0x24   :  { %36 = dma.vmem_to_hbm [thread:$0]  %s34_s12, 32, %s109_s1, [#allocation4]  }
  0x25   :  { %88 = dma.done.wait [#allocation4], 32  }
  0x26   :  { %89 = vsyncadd [#allocation4], 4294967264 }
  0x27   :  { %40 = vsyncpa [#allocation3], 1 }
  0x28   :  { %41 = vsyncpa [#allocation4], 1 }

</bundles_post_ra>
